<compile_context>
chip_gen: v7x
topology: tpu7x:2x2x1
jax: 0.10.0
libtpu: 0.0.40
codegen_flags: <defaults>
</compile_context>

<pallas_src>
import jax
import jax.numpy as jnp
from jax.experimental import pallas as pl
from jax.experimental.pallas import tpu as pltpu


def _round_up(x, m):
    return ((x + m - 1) // m) * m


def _pick_tiles(n):
    """Pad node count and pick (row, reduction) tile sizes that divide it."""
    if n <= 512:
        n_pad = _round_up(n, 128)
        return n_pad, 128, 128
    n_pad = _round_up(n, 512)
    return n_pad, 256, 512


# ----------------------------- Pallas kernels --------------------------------

def _prop_kernel(a_ref, m_ref, b_ref, o_ref, acc_ref):
    """One (tm, Hp) row tile of relu(A @ M + b); K accumulated over grid axis 1."""
    k = pl.program_id(1)

    @pl.when(k == 0)
    def _():
        acc_ref[...] = jnp.zeros_like(acc_ref)

    acc_ref[...] += jnp.dot(a_ref[...], m_ref[...],
                            preferred_element_type=jnp.float32)

    @pl.when(k == pl.num_programs(1) - 1)
    def _():
        o_ref[...] = jnp.maximum(acc_ref[...] + b_ref[...], 0.0).astype(o_ref.dtype)


def _prop_matmul_kernel(a_ref, m_ref, w_ref, b_ref, o_ref, acc_ref):
    """One (tm, Hp) row tile of relu((A @ M) @ W + b) == relu(A @ (M @ W) + b)."""
    k = pl.program_id(1)

    @pl.when(k == 0)
    def _():
        acc_ref[...] = jnp.zeros_like(acc_ref)

    acc_ref[...] += jnp.dot(a_ref[...], m_ref[...],
                            preferred_element_type=jnp.float32)

    @pl.when(k == pl.num_programs(1) - 1)
    def _():
        h = jnp.dot(acc_ref[...].astype(w_ref.dtype), w_ref[...],
                    preferred_element_type=jnp.float32)
        o_ref[...] = jnp.maximum(h + b_ref[...], 0.0).astype(o_ref.dtype)


def _pool_kernel(p_ref, h_ref, o_ref, acc_ref):
    """Tiled node reduction: pooled = P @ H, P is the (G, N) mean-pool matrix."""
    k = pl.program_id(0)

    @pl.when(k == 0)
    def _():
        acc_ref[...] = jnp.zeros_like(acc_ref)

    acc_ref[...] += jnp.dot(p_ref[...], h_ref[...],
                            preferred_element_type=jnp.float32)

    @pl.when(k == pl.num_programs(0) - 1)
    def _():
        o_ref[...] = acc_ref[...]


# ----------------------------- kernel wrappers --------------------------------

def _gcn_propagate(a_bf16, m_bf16, bias_f32, w_bf16, *, tm, tk):
    """relu(A @ M [@ W] + b) with a tiled (row, K) grid and f32 accumulator."""
    n_pad = a_bf16.shape[0]
    hp = bias_f32.shape[1]
    grid = (n_pad // tm, n_pad // tk)

    a_spec = pl.BlockSpec((tm, tk), lambda i, k: (i, k))
    m_spec = pl.BlockSpec((tk, m_bf16.shape[1]), lambda i, k: (k, 0))
    b_spec = pl.BlockSpec((1, hp), lambda i, k: (0, 0))
    out_spec = pl.BlockSpec((tm, hp), lambda i, k: (i, 0))

    if w_bf16 is None:
        kernel = _prop_kernel
        in_specs = [a_spec, m_spec, b_spec]
        args = (a_bf16, m_bf16, bias_f32)
    else:
        kernel = _prop_matmul_kernel
        w_spec = pl.BlockSpec(w_bf16.shape, lambda i, k: (0, 0))
        in_specs = [a_spec, m_spec, w_spec, b_spec]
        args = (a_bf16, m_bf16, w_bf16, bias_f32)

    return pl.pallas_call(
        kernel,
        out_shape=jax.ShapeDtypeStruct((n_pad, hp), jnp.bfloat16),
        grid=grid,
        in_specs=in_specs,
        out_specs=out_spec,
        scratch_shapes=[pltpu.VMEM((tm, hp), jnp.float32)],
        compiler_params=pltpu.CompilerParams(
            dimension_semantics=("parallel", "arbitrary")),
    )(*args)


def _mean_pool(pool_bf16, h_bf16, *, tk):
    """global_mean_pool as a tiled reduction over node tiles -> (G, Hp) f32."""
    g, n_pad = pool_bf16.shape
    hp = h_bf16.shape[1]
    return pl.pallas_call(
        _pool_kernel,
        out_shape=jax.ShapeDtypeStruct((g, hp), jnp.float32),
        grid=(n_pad // tk,),
        in_specs=[pl.BlockSpec((g, tk), lambda k: (0, k)),
                  pl.BlockSpec((tk, hp), lambda k: (k, 0))],
        out_specs=pl.BlockSpec((g, hp), lambda k: (0, 0)),
        scratch_shapes=[pltpu.VMEM((g, hp), jnp.float32)],
        compiler_params=pltpu.CompilerParams(
            dimension_semantics=("arbitrary",)),
    )(pool_bf16, h_bf16)


@jax.jit
def yield_gnn_forward(a_hat, x, w1, b1, w2, b2, pool, w_lin, b_lin):
    n = a_hat.shape[0]
    h_dim = w1.shape[1]
    hp = _round_up(h_dim, 128)
    n_pad, tm, tk = _pick_tiles(n)

    # Zero-pad node count (A rows/cols, X rows, pool cols) and hidden dim.
    # Padded nodes have zero A rows/cols and zero pool weight, so they never
    # contaminate real nodes or the pooled result.
    a_p = jnp.pad(a_hat, ((0, n_pad - n), (0, n_pad - n))).astype(jnp.bfloat16)
    x_p = jnp.pad(x, ((0, n_pad - n), (0, 0)))
    pool_p = jnp.pad(pool, ((0, 0), (0, n_pad - n))).astype(jnp.bfloat16)
    w1_p = jnp.pad(w1, ((0, 0), (0, hp - h_dim)))
    b1_p = jnp.pad(b1, (0, hp - h_dim)).reshape(1, hp).astype(jnp.float32)
    w2_p = jnp.pad(w2, ((0, hp - h_dim), (0, hp - h_dim))).astype(jnp.bfloat16)
    b2_p = jnp.pad(b2, (0, hp - h_dim)).reshape(1, hp).astype(jnp.float32)

    # GCN layer 1: the (N,F)@(F,H) projection has tiny K -> hoisted to XLA;
    # the kernel does the heavy propagation relu(A @ (X W1) + b1).
    xw1 = jnp.dot(x_p, w1_p).astype(jnp.bfloat16)               # (Np, Hp)
    h1 = _gcn_propagate(a_p, xw1, b1_p, None, tm=tm, tk=tk)     # (Np, Hp) bf16

    # GCN layer 2: relu(A @ (h1 W2) + b2) == relu((A @ h1) W2 + b2);
    # W2 is applied in the kernel finalize, so h1@W2 never hits HBM.
    h2 = _gcn_propagate(a_p, h1, b2_p, w2_p, tm=tm, tk=tk)      # (Np, Hp) bf16

    # global_mean_pool as a tiled node reduction -> lane-dense (G, Hp) output.
    pooled = _mean_pool(pool_p, h2, tk=tk)                      # (G, Hp) f32

    # Tiny (H,1) head + bias + squeeze in the wrapper so Pallas stores stay
    # 128 lanes wide (no (G,1) masked stores).
    y = jnp.dot(pooled[:, :h_dim], w_lin) + b_lin               # (G, 1)
    return jnp.squeeze(y, axis=-1)


# ------------------------- graph preprocessing (glue) -------------------------

def build_normalized_adjacency(edge_index, num_nodes):
    """Dense A_hat = D^-1/2 (A + I) D^-1/2, matching PyG GCNConv defaults."""
    src, dst = edge_index
    a = jnp.zeros((num_nodes, num_nodes), jnp.float32)
    a = a.at[dst, src].add(1.0)                          # message src -> dst
    a = a + jnp.eye(num_nodes, dtype=jnp.float32)        # self-loops
    deg = jnp.sum(a, axis=1)
    d_inv_sqrt = jnp.where(deg > 0, 1.0 / jnp.sqrt(deg), 0.0)
    return d_inv_sqrt[:, None] * a * d_inv_sqrt[None, :]


def build_mean_pool_matrix(batch, num_graphs):
    """pool[g, i] = 1/count_g if batch[i] == g else 0."""
    onehot = (batch[None, :] == jnp.arange(num_graphs)[:, None]).astype(jnp.float32)
    counts = jnp.sum(onehot, axis=1, keepdims=True)
    return onehot / jnp.maximum(counts, 1.0)


if __name__ == "__main__":
    # Small shapes consistent with the module: hidden_dim=128 (module default),
    # F node features, N nodes over G graphs.  NOTE: at this toy size the run
    # is dominated by pallas_call fixed cost; tuning matters at production N.
    N, F, H, G = 16, 4, 128, 2

    key = jax.random.PRNGKey(0)
    kx, kw1, kb1, kw2, kb2, kwl, kbl = jax.random.split(key, 7)

    # Parameters (GCNConv weight: in x out; Linear: H -> 1).
    w1 = jax.random.normal(kw1, (F, H), jnp.float32) * 0.1
    b1 = jax.random.normal(kb1, (H,), jnp.float32) * 0.1
    w2 = jax.random.normal(kw2, (H, H), jnp.float32) * 0.1
    b2 = jax.random.normal(kb2, (H,), jnp.float32) * 0.1
    w_lin = jax.random.normal(kwl, (H, 1), jnp.float32) * 0.1
    b_lin = jax.random.normal(kbl, (1,), jnp.float32) * 0.1

    # Deterministic example batch: 2 ring graphs of 8 nodes each.
    x = jax.random.normal(kx, (N, F), jnp.float32)
    edges = []
    for g in range(G):
        base = g * 8
        for i in range(8):
            a_node = base + i
            b_node = base + (i + 1) % 8
            edges.append((a_node, b_node))
            edges.append((b_node, a_node))           # undirected
    edge_index = jnp.array(edges, jnp.int32).T       # (2, E)
    batch = jnp.repeat(jnp.arange(G, dtype=jnp.int32), 8)

    a_hat = build_normalized_adjacency(edge_index, N)
    pool = build_mean_pool_matrix(batch, G)

    out = yield_gnn_forward(a_hat, x, w1, b1, w2, b2, pool, w_lin, b_lin)
    jax.block_until_ready(out)

    # Plain-JAX f32 reference of the same math (kernel uses bf16 operands,
    # so the tolerance is relaxed vs the original 1e-5).
    h_ref = jnp.maximum(a_hat @ (x @ w1) + b1, 0.0)
    h_ref = jnp.maximum(a_hat @ (h_ref @ w2) + b2, 0.0)
    ref = ((pool @ h_ref) @ w_lin + b_lin)[:, 0]
    assert out.shape == (G,)
    assert jnp.allclose(out, ref, atol=2e-2, rtol=2e-2), (out, ref)

    print("KERNEL_OK")
</pallas_src>

<mosaic_0001>
module attributes {stable_mosaic.version = 11 : i64} {
  func.func @_prop_kernel(%arg0: i32, %arg1: i32, %arg2: memref<128x128xbf16, #tpu.memory_space<vmem>>, %arg3: memref<128x128xbf16, #tpu.memory_space<vmem>>, %arg4: memref<1x128xf32, #tpu.memory_space<vmem>>, %arg5: memref<128x128xbf16, #tpu.memory_space<vmem>>, %arg6: memref<128x128xf32, #tpu.memory_space<vmem>>) attributes {dimension_semantics = [#tpu.dimension_semantics<parallel>, #tpu.dimension_semantics<arbitrary>], iteration_bounds = array<i64: 1, 1>, scalar_prefetch = 0 : i64, scratch_operands = 1 : i64, tpu.core_type = #tpu.core_type<tc>, window_params = [{transform_indices = @transform_0, window_bounds = array<i64: 128, 128>}, {transform_indices = @transform_1, window_bounds = array<i64: 128, 128>}, {pipeline_mode = #tpu.pipeline_mode<synchronous>, transform_indices = @transform_2, window_bounds = array<i64: 1, 128>}, {transform_indices = @transform_3, window_bounds = array<i64: 128, 128>}]} {
    %c0_i32 = arith.constant 0 : i32
    %0 = arith.cmpi eq, %arg1, %c0_i32 : i32
    %1 = arith.extui %0 : i1 to i32
    %c0_i32_0 = arith.constant 0 : i32
    %2 = arith.cmpi ne, %1, %c0_i32_0 : i32
    scf.if %2 {
      %cst_10 = arith.constant 0.000000e+00 : f32
      %12 = vector.broadcast %cst_10 : f32 to vector<128x128xf32>
      %c0_11 = arith.constant 0 : index
      %c0_12 = arith.constant 0 : index
      %13 = vector.load %arg6[%c0_11, %c0_12] : memref<128x128xf32, #tpu.memory_space<vmem>>, vector<128x128xf32>
      tpu.vector_store %arg6[%c0_11, %c0_12], %12 {strides = array<i32>} : memref<128x128xf32, #tpu.memory_space<vmem>>, vector<128x128xf32>,
    } else {
    }
    %c0 = arith.constant 0 : index
    %c0_1 = arith.constant 0 : index
    %3 = vector.load %arg6[%c0, %c0_1] : memref<128x128xf32, #tpu.memory_space<vmem>>, vector<128x128xf32>
    %c0_2 = arith.constant 0 : index
    %c0_3 = arith.constant 0 : index
    %4 = vector.load %arg2[%c0_2, %c0_3] : memref<128x128xbf16, #tpu.memory_space<vmem>>, vector<128x128xbf16>
    %c0_4 = arith.constant 0 : index
    %c0_5 = arith.constant 0 : index
    %5 = vector.load %arg3[%c0_4, %c0_5] : memref<128x128xbf16, #tpu.memory_space<vmem>>, vector<128x128xbf16>
    %cst = arith.constant dense<0.000000e+00> : vector<128x128xf32>
    %6 = tpu.matmul %4, %5, %cst {dimension_numbers = #tpu.dot_dimension_numbers<[1], [0], [0], [1], [0, 0, 1, 1], [], []>} : vector<128x128xbf16>, vector<128x128xbf16>, vector<128x128xf32> -> vector<128x128xf32>
    %7 = arith.addf %3, %6 : vector<128x128xf32>
    %c0_6 = arith.constant 0 : index
    %c0_7 = arith.constant 0 : index
    %8 = vector.load %arg6[%c0_6, %c0_7] : memref<128x128xf32, #tpu.memory_space<vmem>>, vector<128x128xf32>
    tpu.vector_store %arg6[%c0_6, %c0_7], %7 {strides = array<i32>} : memref<128x128xf32, #tpu.memory_space<vmem>>, vector<128x128xf32>,
    %c0_i32_8 = arith.constant 0 : i32
    %9 = arith.cmpi eq, %arg1, %c0_i32_8 : i32
    %10 = arith.extui %9 : i1 to i32
    %c0_i32_9 = arith.constant 0 : i32
    %11 = arith.cmpi ne, %10, %c0_i32_9 : i32
    scf.if %11 {
      %c0_10 = arith.constant 0 : index
      %c0_11 = arith.constant 0 : index
      %12 = vector.load %arg6[%c0_10, %c0_11] : memref<128x128xf32, #tpu.memory_space<vmem>>, vector<128x128xf32>
      %c0_12 = arith.constant 0 : index
      %c0_13 = arith.constant 0 : index
      %13 = vector.load %arg4[%c0_12, %c0_13] : memref<1x128xf32, #tpu.memory_space<vmem>>, vector<1x128xf32>
      %14 = vector.broadcast %13 : vector<1x128xf32> to vector<128x128xf32>
      %15 = arith.addf %12, %14 : vector<128x128xf32>
      %cst_14 = arith.constant 0.000000e+00 : f32
      %16 = vector.broadcast %cst_14 : f32 to vector<128x128xf32>
      %17 = arith.maximumf %15, %16 : vector<128x128xf32>
      %18 = arith.truncf %17 : vector<128x128xf32> to vector<128x128xbf16>
      %c0_15 = arith.constant 0 : index
      %c0_16 = arith.constant 0 : index
      %19 = vector.load %arg5[%c0_15, %c0_16] : memref<128x128xbf16, #tpu.memory_space<vmem>>, vector<128x128xbf16>
      tpu.vector_store %arg5[%c0_15, %c0_16], %18 {strides = array<i32>} : memref<128x128xbf16, #tpu.memory_space<vmem>>, vector<128x128xbf16>,
    } else {
    }
    return
  }
  func.func @transform_0(%arg0: i32, %arg1: i32) -> (i32, i32) {
    %c0_i32 = arith.constant 0 : i32
    return %arg0, %arg1 : i32, i32
  }
  func.func @transform_1(%arg0: i32, %arg1: i32) -> (i32, i32) {
    %c0_i32 = arith.constant 0 : i32
    %c0_i32_0 = arith.constant 0 : i32
    return %arg1, %c0_i32 : i32, i32
  }
  func.func @transform_2(%arg0: i32, %arg1: i32) -> (i32, i32) {
    %c0_i32 = arith.constant 0 : i32
    %c0_i32_0 = arith.constant 0 : i32
    %c0_i32_1 = arith.constant 0 : i32
    return %c0_i32, %c0_i32_0 : i32, i32
  }
  func.func @transform_3(%arg0: i32, %arg1: i32) -> (i32, i32) {
    %c0_i32 = arith.constant 0 : i32
    %c0_i32_0 = arith.constant 0 : i32
    return %arg0, %c0_i32 : i32, i32
  }
}

module attributes {stable_mosaic.version = 11 : i64} {
  func.func @_prop_matmul_kernel(%arg0: i32, %arg1: i32, %arg2: memref<128x128xbf16, #tpu.memory_space<vmem>>, %arg3: memref<128x128xbf16, #tpu.memory_space<vmem>>, %arg4: memref<128x128xbf16, #tpu.memory_space<vmem>>, %arg5: memref<1x128xf32, #tpu.memory_space<vmem>>, %arg6: memref<128x128xbf16, #tpu.memory_space<vmem>>, %arg7: memref<128x128xf32, #tpu.memory_space<vmem>>) attributes {dimension_semantics = [#tpu.dimension_semantics<parallel>, #tpu.dimension_semantics<arbitrary>], iteration_bounds = array<i64: 1, 1>, scalar_prefetch = 0 : i64, scratch_operands = 1 : i64, tpu.core_type = #tpu.core_type<tc>, window_params = [{transform_indices = @transform_0, window_bounds = array<i64: 128, 128>}, {transform_indices = @transform_1, window_bounds = array<i64: 128, 128>}, {pipeline_mode = #tpu.pipeline_mode<synchronous>, transform_indices = @transform_2, window_bounds = array<i64: 128, 128>}, {pipeline_mode = #tpu.pipeline_mode<synchronous>, transform_indices = @transform_3, window_bounds = array<i64: 1, 128>}, {transform_indices = @transform_4, window_bounds = array<i64: 128, 128>}]} {
    %c0_i32 = arith.constant 0 : i32
    %0 = arith.cmpi eq, %arg1, %c0_i32 : i32
    %1 = arith.extui %0 : i1 to i32
    %c0_i32_0 = arith.constant 0 : i32
    %2 = arith.cmpi ne, %1, %c0_i32_0 : i32
    scf.if %2 {
      %cst_10 = arith.constant 0.000000e+00 : f32
      %12 = vector.broadcast %cst_10 : f32 to vector<128x128xf32>
      %c0_11 = arith.constant 0 : index
      %c0_12 = arith.constant 0 : index
      %13 = vector.load %arg7[%c0_11, %c0_12] : memref<128x128xf32, #tpu.memory_space<vmem>>, vector<128x128xf32>
      tpu.vector_store %arg7[%c0_11, %c0_12], %12 {strides = array<i32>} : memref<128x128xf32, #tpu.memory_space<vmem>>, vector<128x128xf32>,
    } else {
    }
    %c0 = arith.constant 0 : index
    %c0_1 = arith.constant 0 : index
    %3 = vector.load %arg7[%c0, %c0_1] : memref<128x128xf32, #tpu.memory_space<vmem>>, vector<128x128xf32>
    %c0_2 = arith.constant 0 : index
    %c0_3 = arith.constant 0 : index
    %4 = vector.load %arg2[%c0_2, %c0_3] : memref<128x128xbf16, #tpu.memory_space<vmem>>, vector<128x128xbf16>
    %c0_4 = arith.constant 0 : index
    %c0_5 = arith.constant 0 : index
    %5 = vector.load %arg3[%c0_4, %c0_5] : memref<128x128xbf16, #tpu.memory_space<vmem>>, vector<128x128xbf16>
    %cst = arith.constant dense<0.000000e+00> : vector<128x128xf32>
    %6 = tpu.matmul %4, %5, %cst {dimension_numbers = #tpu.dot_dimension_numbers<[1], [0], [0], [1], [0, 0, 1, 1], [], []>} : vector<128x128xbf16>, vector<128x128xbf16>, vector<128x128xf32> -> vector<128x128xf32>
    %7 = arith.addf %3, %6 : vector<128x128xf32>
    %c0_6 = arith.constant 0 : index
    %c0_7 = arith.constant 0 : index
    %8 = vector.load %arg7[%c0_6, %c0_7] : memref<128x128xf32, #tpu.memory_space<vmem>>, vector<128x128xf32>
    tpu.vector_store %arg7[%c0_6, %c0_7], %7 {strides = array<i32>} : memref<128x128xf32, #tpu.memory_space<vmem>>, vector<128x128xf32>,
    %c0_i32_8 = arith.constant 0 : i32
    %9 = arith.cmpi eq, %arg1, %c0_i32_8 : i32
    %10 = arith.extui %9 : i1 to i32
    %c0_i32_9 = arith.constant 0 : i32
    %11 = arith.cmpi ne, %10, %c0_i32_9 : i32
    scf.if %11 {
      %c0_10 = arith.constant 0 : index
      %c0_11 = arith.constant 0 : index
      %12 = vector.load %arg7[%c0_10, %c0_11] : memref<128x128xf32, #tpu.memory_space<vmem>>, vector<128x128xf32>
      %13 = arith.truncf %12 : vector<128x128xf32> to vector<128x128xbf16>
      %c0_12 = arith.constant 0 : index
      %c0_13 = arith.constant 0 : index
      %14 = vector.load %arg4[%c0_12, %c0_13] : memref<128x128xbf16, #tpu.memory_space<vmem>>, vector<128x128xbf16>
      %cst_14 = arith.constant dense<0.000000e+00> : vector<128x128xf32>
      %15 = tpu.matmul %13, %14, %cst_14 {dimension_numbers = #tpu.dot_dimension_numbers<[1], [0], [0], [1], [0, 0, 1, 1], [], []>} : vector<128x128xbf16>, vector<128x128xbf16>, vector<128x128xf32> -> vector<128x128xf32>
      %c0_15 = arith.constant 0 : index
      %c0_16 = arith.constant 0 : index
      %16 = vector.load %arg5[%c0_15, %c0_16] : memref<1x128xf32, #tpu.memory_space<vmem>>, vector<1x128xf32>
      %17 = vector.broadcast %16 : vector<1x128xf32> to vector<128x128xf32>
      %18 = arith.addf %15, %17 : vector<128x128xf32>
      %cst_17 = arith.constant 0.000000e+00 : f32
      %19 = vector.broadcast %cst_17 : f32 to vector<128x128xf32>
      %20 = arith.maximumf %18, %19 : vector<128x128xf32>
      %21 = arith.truncf %20 : vector<128x128xf32> to vector<128x128xbf16>
      %c0_18 = arith.constant 0 : index
      %c0_19 = arith.constant 0 : index
      %22 = vector.load %arg6[%c0_18, %c0_19] : memref<128x128xbf16, #tpu.memory_space<vmem>>, vector<128x128xbf16>
      tpu.vector_store %arg6[%c0_18, %c0_19], %21 {strides = array<i32>} : memref<128x128xbf16, #tpu.memory_space<vmem>>, vector<128x128xbf16>,
    } else {
    }
    return
  }
  func.func @transform_0(%arg0: i32, %arg1: i32) -> (i32, i32) {
    %c0_i32 = arith.constant 0 : i32
    return %arg0, %arg1 : i32, i32
  }
  func.func @transform_1(%arg0: i32, %arg1: i32) -> (i32, i32) {
    %c0_i32 = arith.constant 0 : i32
    %c0_i32_0 = arith.constant 0 : i32
    return %arg1, %c0_i32 : i32, i32
  }
  func.func @transform_2(%arg0: i32, %arg1: i32) -> (i32, i32) {
    %c0_i32 = arith.constant 0 : i32
    %c0_i32_0 = arith.constant 0 : i32
    %c0_i32_1 = arith.constant 0 : i32
    return %c0_i32, %c0_i32_0 : i32, i32
  }
  func.func @transform_3(%arg0: i32, %arg1: i32) -> (i32, i32) {
    %c0_i32 = arith.constant 0 : i32
    %c0_i32_0 = arith.constant 0 : i32
    %c0_i32_1 = arith.constant 0 : i32
    return %c0_i32, %c0_i32_0 : i32, i32
  }
  func.func @transform_4(%arg0: i32, %arg1: i32) -> (i32, i32) {
    %c0_i32 = arith.constant 0 : i32
    %c0_i32_0 = arith.constant 0 : i32
    return %arg0, %c0_i32 : i32, i32
  }
}

module attributes {stable_mosaic.version = 11 : i64} {
  func.func @_pool_kernel(%arg0: i32, %arg1: memref<2x128xbf16, #tpu.memory_space<vmem>>, %arg2: memref<128x128xbf16, #tpu.memory_space<vmem>>, %arg3: memref<2x128xf32, #tpu.memory_space<vmem>>, %arg4: memref<2x128xf32, #tpu.memory_space<vmem>>) attributes {dimension_semantics = [#tpu.dimension_semantics<arbitrary>], iteration_bounds = array<i64: 1>, scalar_prefetch = 0 : i64, scratch_operands = 1 : i64, tpu.core_type = #tpu.core_type<tc>, window_params = [{transform_indices = @transform_0, window_bounds = array<i64: 2, 128>}, {transform_indices = @transform_1, window_bounds = array<i64: 128, 128>}, {pipeline_mode = #tpu.pipeline_mode<synchronous>, transform_indices = @transform_2, window_bounds = array<i64: 2, 128>}]} {
    %c0_i32 = arith.constant 0 : i32
    %0 = arith.cmpi eq, %arg0, %c0_i32 : i32
    %1 = arith.extui %0 : i1 to i32
    %c0_i32_0 = arith.constant 0 : i32
    %2 = arith.cmpi ne, %1, %c0_i32_0 : i32
    scf.if %2 {
      %cst_10 = arith.constant 0.000000e+00 : f32
      %12 = vector.broadcast %cst_10 : f32 to vector<2x128xf32>
      %c0_11 = arith.constant 0 : index
      %c0_12 = arith.constant 0 : index
      %13 = vector.load %arg4[%c0_11, %c0_12] : memref<2x128xf32, #tpu.memory_space<vmem>>, vector<2x128xf32>
      tpu.vector_store %arg4[%c0_11, %c0_12], %12 {strides = array<i32>} : memref<2x128xf32, #tpu.memory_space<vmem>>, vector<2x128xf32>,
    } else {
    }
    %c0 = arith.constant 0 : index
    %c0_1 = arith.constant 0 : index
    %3 = vector.load %arg4[%c0, %c0_1] : memref<2x128xf32, #tpu.memory_space<vmem>>, vector<2x128xf32>
    %c0_2 = arith.constant 0 : index
    %c0_3 = arith.constant 0 : index
    %4 = vector.load %arg1[%c0_2, %c0_3] : memref<2x128xbf16, #tpu.memory_space<vmem>>, vector<2x128xbf16>
    %c0_4 = arith.constant 0 : index
    %c0_5 = arith.constant 0 : index
    %5 = vector.load %arg2[%c0_4, %c0_5] : memref<128x128xbf16, #tpu.memory_space<vmem>>, vector<128x128xbf16>
    %cst = arith.constant dense<0.000000e+00> : vector<2x128xf32>
    %6 = tpu.matmul %4, %5, %cst {dimension_numbers = #tpu.dot_dimension_numbers<[1], [0], [0], [1], [0, 0, 1, 1], [], []>} : vector<2x128xbf16>, vector<128x128xbf16>, vector<2x128xf32> -> vector<2x128xf32>
    %7 = arith.addf %3, %6 : vector<2x128xf32>
    %c0_6 = arith.constant 0 : index
    %c0_7 = arith.constant 0 : index
    %8 = vector.load %arg4[%c0_6, %c0_7] : memref<2x128xf32, #tpu.memory_space<vmem>>, vector<2x128xf32>
    tpu.vector_store %arg4[%c0_6, %c0_7], %7 {strides = array<i32>} : memref<2x128xf32, #tpu.memory_space<vmem>>, vector<2x128xf32>,
    %c0_i32_8 = arith.constant 0 : i32
    %9 = arith.cmpi eq, %arg0, %c0_i32_8 : i32
    %10 = arith.extui %9 : i1 to i32
    %c0_i32_9 = arith.constant 0 : i32
    %11 = arith.cmpi ne, %10, %c0_i32_9 : i32
    scf.if %11 {
      %c0_10 = arith.constant 0 : index
      %c0_11 = arith.constant 0 : index
      %12 = vector.load %arg4[%c0_10, %c0_11] : memref<2x128xf32, #tpu.memory_space<vmem>>, vector<2x128xf32>
      %c0_12 = arith.constant 0 : index
      %c0_13 = arith.constant 0 : index
      %13 = vector.load %arg3[%c0_12, %c0_13] : memref<2x128xf32, #tpu.memory_space<vmem>>, vector<2x128xf32>
      tpu.vector_store %arg3[%c0_12, %c0_13], %12 {strides = array<i32>} : memref<2x128xf32, #tpu.memory_space<vmem>>, vector<2x128xf32>,
    } else {
    }
    return
  }
  func.func @transform_0(%arg0: i32) -> (i32, i32) {
    %c0_i32 = arith.constant 0 : i32
    %c0_i32_0 = arith.constant 0 : i32
    return %c0_i32, %arg0 : i32, i32
  }
  func.func @transform_1(%arg0: i32) -> (i32, i32) {
    %c0_i32 = arith.constant 0 : i32
    %c0_i32_0 = arith.constant 0 : i32
    return %arg0, %c0_i32 : i32, i32
  }
  func.func @transform_2(%arg0: i32) -> (i32, i32) {
    %c0_i32 = arith.constant 0 : i32
    %c0_i32_0 = arith.constant 0 : i32
    %c0_i32_1 = arith.constant 0 : i32
    return %c0_i32, %c0_i32_0 : i32, i32
  }
}

</mosaic_0001>

<bundles_post_ra>
// kernel: yield_gnn_forward.5
= control target key start
LH: loop header
LB: loop body
LE: loop exit
PB: predicated region body
PF: predicated region fallthrough
CT: control target
= control target key end

     0   :  { %v181_v0 = vmov 0.0   ;;  %vm182_vm0 = vmmov 0   ;;  %s228_s1 = inlined_call_operand.vmem [shape: bf16[128,128], index: 1, kind: input, shape index: {}]   ;;  %s229_s0 = inlined_call_operand.vmem [shape: bf16[2,128], index: 0, kind: input, shape index: {}]   ;;  %s230_s2 = inlined_call_operand.vmem [shape: f32[2,128], index: 2, kind: output, shape index: {}]  }
   0x1   :  { %151 = vmatprep.subr.bf16.mxu0 %v181_v0  ;;  %16 = vst [vmem:[#allocation2] sm:$0x3] %v181_v0  ;;  %v173_v1 = vld [vmem:[%s228_s1] sm:$0xff]   ;;  %167 = vmatprep.mubr.msk.bf16.mxu0 %vm182_vm0, %v181_v0  ;;  %v174_v2 = vld [vmem:[%s228_s1 + $0x8] sm:$0xff]   ;;  %v175_v3 = vld [vmem:[%s228_s1 + $0x10] sm:$0xff]  }
   0x2   :  { %152 = vmatpush3.bf16.msra.mxu0 %v173_v1  ;;  %v176_v4 = vld [vmem:[%s228_s1 + $0x18] sm:$0xff]   ;;  %v177_v5 = vld [vmem:[%s228_s1 + $0x20] sm:$0xff]   ;;  %v178_v6 = vld [vmem:[%s228_s1 + $0x28] sm:$0xff]  }
   0x3   :  { %153 = vmatprep.subr.bf16.mxu0 %v181_v0  ;;  %v179_v7 = vld [vmem:[%s228_s1 + $0x30] sm:$0xff]   ;;  %v180_v8 = vld [vmem:[%s228_s1 + $0x38] sm:$0xff]   ;;  %v18_v9 = vld [vmem:[%s229_s0] sm:$0x1] }
   0x6   :  { %154 = vmatpush3.bf16.msra.mxu0 %v174_v2 }
   0x7   :  { %155 = vmatprep.subr.bf16.mxu0 %v181_v0 }
   0x8   :  { %v17_v10 = vld [vmem:[#allocation2] sm:$0x3] }
   0xa   :  { %156 = vmatpush3.bf16.msra.mxu0 %v175_v3 }
   0xb   :  { %157 = vmatprep.subr.bf16.mxu0 %v181_v0 }
   0xe   :  { %158 = vmatpush3.bf16.msra.mxu0 %v176_v4 }
   0xf   :  { %159 = vmatprep.subr.bf16.mxu0 %v181_v0 }
  0x12   :  { %160 = vmatpush3.bf16.msra.mxu0 %v177_v5 }
  0x13   :  { %161 = vmatprep.subr.bf16.mxu0 %v181_v0 }
  0x16   :  { %162 = vmatpush3.bf16.msra.mxu0 %v178_v6 }
  0x17   :  { %163 = vmatprep.subr.bf16.mxu0 %v181_v0 }
  0x1a   :  { %164 = vmatpush3.bf16.msra.mxu0 %v179_v7 }
  0x1b   :  { %165 = vmatprep.subr.bf16.mxu0 %v181_v0 }
  0x1e   :  { %166 = vmatpush3.bf16.msra.mxu0 %v180_v8 }
  0x21   :  { %168 = vmatmul.mubr.bf16.vlgmr.msra.gmra.mrb[0].mxu0 %v18_v9 }
  0xf4   :  { %v117_v11 = vpop.f32.mrb[0].mxu0 }
  0xf5   :  { %v123_v12 = vadd.f32 %v117_v11, %v17_v10  ;;  %v169_v13 = vpop.f32.mrb[1].mxu0 }
  0xf6   :  { %v120_v14 = vpop.f32.mrb[2].mxu0 }
  0xf7   :  { %124 = vst [vmem:[#allocation2] sm:$0x3] %v123_v12  ;;  %v170_v15 = vpop.f32.mrb[3].mxu0 }
  0xfe   :  { %v128_v16 = vld [vmem:[#allocation2] sm:$0x3] }
  0xff   :  { %129 = vst [vmem:[%s230_s2] sm:$0x3] %v128_v16 }

// kernel: yield_gnn_forward.3
= control target key start
LH: loop header
LB: loop body
LE: loop exit
PB: predicated region body
PF: predicated region fallthrough
CT: control target
= control target key end

     0   :  { %s721_s1 = inlined_call_operand.vmem [shape: bf16[128,128], index: 1, kind: input, shape index: {}]   ;;  %s722_s0 = inlined_call_operand.vmem [shape: bf16[128,128], index: 0, kind: input, shape index: {}]   ;;  %s723_s2 = inlined_call_operand.vmem [shape: f32[1,128], index: 2, kind: input, shape index: {}]   ;;  %s724_s3 = inlined_call_operand.vmem [shape: bf16[128,128], index: 3, kind: output, shape index: {}]  }
   0x1   :  { %v610_v0 = vld [vmem:[%s721_s1] sm:$0xff]   ;;  %v611_v1 = vld [vmem:[%s721_s1 + $0x8] sm:$0xff]   ;;  %v612_v2 = vld [vmem:[%s721_s1 + $0x10] sm:$0xff]  }
   0x2   :  { %562 = vmatprep.subr.bf16.mxu0 %v610_v0  ;;  %594 = vmatprep.subr.bf16.mxu1 %v610_v0  ;;  %v613_v3 = vld [vmem:[%s721_s1 + $0x18] sm:$0xff]   ;;  %v618_v4 = vld [vmem:[%s722_s0] sm:$0xff]   ;;  %v615_v7 = vld [vmem:[%s721_s1 + $0x28] sm:$0xff]  }
   0x3   :  { %563 = vmatpush3.bf16.msra.mxu0 %v610_v0  ;;  %602 = vmatpush3.bf16.msra.mxu1 %v610_v0  ;;  %v619_v5 = vld [vmem:[%s722_s0 + $0x20] sm:$0xff]   ;;  %v616_v8 = vld [vmem:[%s721_s1 + $0x30] sm:$0xff]   ;;  %v617_v9 = vld [vmem:[%s721_s1 + $0x38] sm:$0xff]  }
   0x4   :  { %564 = vmatprep.subr.bf16.mxu0 %v611_v1  ;;  %595 = vmatprep.subr.bf16.mxu1 %v611_v1  ;;  %v614_v6 = vld [vmem:[%s721_s1 + $0x20] sm:$0xff]   ;;  %v620_v10 = vld [vmem:[%s722_s0 + $0x8] sm:$0xff]   ;;  %v622_v12 = vld [vmem:[%s722_s0 + $0x10] sm:$0xff]  }
   0x5   :  { %578 = vmatprep.mubr.bf16.mxu0 %v618_v4  ;;  %586 = vmatprep.mubr.bf16.mxu1 %v619_v5  ;;  %v621_v11 = vld [vmem:[%s722_s0 + $0x28] sm:$0xff]   ;;  %v623_v13 = vld [vmem:[%s722_s0 + $0x30] sm:$0xff]   ;;  %v624_v14 = vld [vmem:[%s722_s0 + $0x18] sm:$0xff]  }
   0x6   :  { %v625_v15 = vld [vmem:[%s722_s0 + $0x38] sm:$0xff]   ;;  %v466_v16 = vld [vmem:[%s723_s2] ss:$0 sm:$0xff] }
   0x7   :  { %565 = vmatpush3.bf16.msra.mxu0 %v611_v1  ;;  %603 = vmatpush3.bf16.msra.mxu1 %v611_v1 }
   0x8   :  { %566 = vmatprep.subr.bf16.mxu0 %v612_v2  ;;  %596 = vmatprep.subr.bf16.mxu1 %v612_v2 }
   0xb   :  { %567 = vmatpush3.bf16.msra.mxu0 %v612_v2  ;;  %604 = vmatpush3.bf16.msra.mxu1 %v612_v2 }
   0xc   :  { %568 = vmatprep.subr.bf16.mxu0 %v613_v3  ;;  %597 = vmatprep.subr.bf16.mxu1 %v613_v3 }
   0xf   :  { %569 = vmatpush3.bf16.msra.mxu0 %v613_v3  ;;  %605 = vmatpush3.bf16.msra.mxu1 %v613_v3 }
  0x10   :  { %570 = vmatprep.subr.bf16.mxu0 %v614_v6  ;;  %598 = vmatprep.subr.bf16.mxu1 %v614_v6 }
  0x13   :  { %571 = vmatpush3.bf16.msra.mxu0 %v614_v6  ;;  %606 = vmatpush3.bf16.msra.mxu1 %v614_v6 }
  0x14   :  { %572 = vmatprep.subr.bf16.mxu0 %v615_v7  ;;  %599 = vmatprep.subr.bf16.mxu1 %v615_v7 }
  0x17   :  { %573 = vmatpush3.bf16.msra.mxu0 %v615_v7  ;;  %607 = vmatpush3.bf16.msra.mxu1 %v615_v7 }
  0x18   :  { %574 = vmatprep.subr.bf16.mxu0 %v616_v8  ;;  %600 = vmatprep.subr.bf16.mxu1 %v616_v8 }
  0x1b   :  { %575 = vmatpush3.bf16.msra.mxu0 %v616_v8  ;;  %608 = vmatpush3.bf16.msra.mxu1 %v616_v8 }
  0x1c   :  { %576 = vmatprep.subr.bf16.mxu0 %v617_v9  ;;  %601 = vmatprep.subr.bf16.mxu1 %v617_v9 }
  0x1f   :  { %577 = vmatpush3.bf16.msra.mxu0 %v617_v9  ;;  %609 = vmatpush3.bf16.msra.mxu1 %v617_v9 }
  0x22   :  { %579 = vmatmul.mubr.bf16.vlgmr.msra.gmra.mrb[0].mxu0 %v620_v10  ;;  %587 = vmatmul.mubr.bf16.vlgmr.msra.gmra.mrb[0].mxu1 %v621_v11 }
  0x23   :  { %582 = vmatprep.mubr.bf16.mxu0 %v622_v12  ;;  %590 = vmatprep.mubr.bf16.mxu1 %v623_v13 }
  0x2a   :  { %583 = vmatmul.mubr.bf16.gmra.mrb[4].mxu0 %v624_v14  ;;  %591 = vmatmul.mubr.bf16.gmra.mrb[4].mxu1 %v625_v15 }
  0xf5   :  { %v580_v17 = vpop.f32.mrb[0].mxu0  ;;  %v588_v18 = vpop.f32.mrb[0].mxu1 }
  0xf6   :  { %v336_v19 = vadd.f32 %v580_v17, %v466_v16  ;;  %v344_v20 = vadd.f32 %v588_v18, %v466_v16  ;;  %v213_v21 = vpop.f32.mrb[1].mxu0  ;;  %v245_v22 = vpop.f32.mrb[1].mxu1 }
  0xf7   :  { %v334_v23 = vadd.f32 %v466_v16, %v213_v21  ;;  %v342_v24 = vadd.f32 %v466_v16, %v245_v22  ;;  %v581_v25 = vpop.f32.mrb[2].mxu0  ;;  %v589_v26 = vpop.f32.mrb[2].mxu1 }
  0xf8   :  { %v337_v27 = vadd.f32 %v581_v25, %v466_v16  ;;  %v345_v28 = vadd.f32 %v589_v26, %v466_v16  ;;  %v216_v29 = vpop.f32.mrb[3].mxu0  ;;  %v248_v30 = vpop.f32.mrb[3].mxu1  ;;  %v352_v33 = vmax.f32 %v336_v19, 0.0  ;;  %v360_v34 = vmax.f32 %v344_v20, 0.0 }
  0xf9   :  { %v335_v31 = vadd.f32 %v466_v16, %v216_v29  ;;  %v343_v32 = vadd.f32 %v466_v16, %v248_v30  ;;  %v350_v37 = vmax.f32 %v334_v23, 0.0  ;;  %v358_v38 = vmax.f32 %v342_v24, 0.0 }
  0xfa   :  { %v353_v35 = vmax.f32 %v337_v27, 0.0  ;;  %v361_v36 = vmax.f32 %v345_v28, 0.0 }
  0xfb   :  { %v351_v39 = vmax.f32 %v335_v31, 0.0  ;;  %v359_v40 = vmax.f32 %v343_v32, 0.0 }
  0xfc   :  { %v507_v41 = vpack.c.bf16 %v353_v35, %v352_v33  ;;  %v527_v42 = vpack.c.bf16 %v361_v36, %v360_v34 }
  0xfd   :  { %v502_v43 = vpack.c.bf16 %v351_v39, %v350_v37  ;;  %v522_v44 = vpack.c.bf16 %v359_v40, %v358_v38  ;;  %v584_v45 = vpop.f32.mrb[4].mxu0  ;;  %v592_v46 = vpop.f32.mrb[4].mxu1 }
  0xfe   :  { %539 = vst [vmem:[%s724_s3 + $0x8] sm:$0xff] %v507_v41   ;;  %543 = vst [vmem:[%s724_s3 + $0x28] sm:$0xff] %v527_v42   ;;  %v340_v47 = vadd.f32 %v584_v45, %v466_v16  ;;  %v348_v48 = vadd.f32 %v592_v46, %v466_v16  ;;  %v229_v49 = vpop.f32.mrb[5].mxu0  ;;  %v261_v50 = vpop.f32.mrb[5].mxu1 }
  0xff   :  { %503 = vst [vmem:[%s724_s3] sm:$0xff] %v502_v43   ;;  %542 = vst [vmem:[%s724_s3 + $0x20] sm:$0xff] %v522_v44   ;;  %v338_v51 = vadd.f32 %v466_v16, %v229_v49  ;;  %v346_v52 = vadd.f32 %v466_v16, %v261_v50  ;;  %v585_v53 = vpop.f32.mrb[6].mxu0  ;;  %v593_v54 = vpop.f32.mrb[6].mxu1 }
 0x100   :  { %v341_v55 = vadd.f32 %v585_v53, %v466_v16  ;;  %v349_v56 = vadd.f32 %v593_v54, %v466_v16  ;;  %v232_v57 = vpop.f32.mrb[7].mxu0  ;;  %v264_v58 = vpop.f32.mrb[7].mxu1  ;;  %v356_v61 = vmax.f32 %v340_v47, 0.0  ;;  %v364_v62 = vmax.f32 %v348_v48, 0.0 }
 0x101   :  { %v339_v59 = vadd.f32 %v466_v16, %v232_v57  ;;  %v347_v60 = vadd.f32 %v466_v16, %v264_v58  ;;  %v354_v1 = vmax.f32 %v338_v51, 0.0  ;;  %v362_v2 = vmax.f32 %v346_v52, 0.0 }
 0x102   :  { %v357_v63 = vmax.f32 %v341_v55, 0.0  ;;  %v365_v0 = vmax.f32 %v349_v56, 0.0 }
 0x103   :  { %v355_v3 = vmax.f32 %v339_v59, 0.0  ;;  %v363_v4 = vmax.f32 %v347_v60, 0.0 }
 0x104   :  { %v517_v5 = vpack.c.bf16 %v357_v63, %v356_v61  ;;  %v537_v6 = vpack.c.bf16 %v365_v0, %v364_v62 }
 0x105   :  { %v512_v7 = vpack.c.bf16 %v355_v3, %v354_v1  ;;  %v532_v8 = vpack.c.bf16 %v363_v4, %v362_v2 }
 0x106   :  { %541 = vst [vmem:[%s724_s3 + $0x18] sm:$0xff] %v517_v5   ;;  %545 = vst [vmem:[%s724_s3 + $0x38] sm:$0xff] %v537_v6  }
 0x107   :  { %540 = vst [vmem:[%s724_s3 + $0x10] sm:$0xff] %v512_v7   ;;  %544 = vst [vmem:[%s724_s3 + $0x30] sm:$0xff] %v532_v8  }

// kernel: yield_gnn_forward.4
= control target key start
LH: loop header
LB: loop body
LE: loop exit
PB: predicated region body
PF: predicated region fallthrough
CT: control target
= control target key end

     0   :  { %s954_s1 = inlined_call_operand.vmem [shape: bf16[128,128], index: 1, kind: input, shape index: {}]   ;;  %s955_s0 = inlined_call_operand.vmem [shape: bf16[128,128], index: 0, kind: input, shape index: {}]   ;;  %s956_s2 = inlined_call_operand.vmem [shape: bf16[128,128], index: 2, kind: input, shape index: {}]   ;;  %s957_s3 = inlined_call_operand.vmem [shape: f32[1,128], index: 3, kind: input, shape index: {}]   ;;  %s958_s4 = inlined_call_operand.vmem [shape: bf16[128,128], index: 4, kind: output, shape index: {}]  }
   0x1   :  { %v806_v0 = vld [vmem:[%s954_s1] sm:$0xff]   ;;  %v807_v1 = vld [vmem:[%s954_s1 + $0x8] sm:$0xff]   ;;  %v808_v2 = vld [vmem:[%s954_s1 + $0x10] sm:$0xff]  }
   0x2   :  { %742 = vmatprep.subr.bf16.mxu0 %v806_v0  ;;  %v809_v3 = vld [vmem:[%s954_s1 + $0x18] sm:$0xff]   ;;  %v814_v4 = vld [vmem:[%s955_s0] sm:$0xff]   ;;  %v811_v6 = vld [vmem:[%s954_s1 + $0x28] sm:$0xff]  }
   0x3   :  { %743 = vmatpush3.bf16.msra.mxu0 %v806_v0  ;;  %758 = vmatprep.mubr.bf16.mxu0 %v814_v4  ;;  %v810_v5 = vld [vmem:[%s954_s1 + $0x20] sm:$0xff]   ;;  %v823_v8 = vld [vmem:[%s956_s2 + $0x8] sm:$0xff]   ;;  %v812_v9 = vld [vmem:[%s954_s1 + $0x30] sm:$0xff]  }
   0x4   :  { %744 = vmatprep.subr.bf16.mxu0 %v807_v1  ;;  %v822_v7 = vld [vmem:[%s956_s2] sm:$0xff]   ;;  %v824_v10 = vld [vmem:[%s956_s2 + $0x10] sm:$0xff]   ;;  %v813_v11 = vld [vmem:[%s954_s1 + $0x38] sm:$0xff]  }
   0x5   :  { %774 = vmatprep.subr.bf16.mxu1 %v822_v7  ;;  %v825_v12 = vld [vmem:[%s956_s2 + $0x18] sm:$0xff]   ;;  %v826_v13 = vld [vmem:[%s956_s2 + $0x20] sm:$0xff]   ;;  %v815_v14 = vld [vmem:[%s955_s0 + $0x8] sm:$0xff]  }
   0x6   :  { %775 = vmatpush3.bf16.msra.mxu1 %v822_v7  ;;  %v816_v15 = vld [vmem:[%s955_s0 + $0x10] sm:$0xff]   ;;  %v827_v16 = vld [vmem:[%s956_s2 + $0x28] sm:$0xff]   ;;  %v817_v18 = vld [vmem:[%s955_s0 + $0x18] sm:$0xff]  }
   0x7   :  { %745 = vmatpush3.bf16.msra.mxu0 %v807_v1  ;;  %776 = vmatprep.subr.bf16.mxu1 %v823_v8  ;;  %v828_v17 = vld [vmem:[%s956_s2 + $0x30] sm:$0xff]   ;;  %v818_v19 = vld [vmem:[%s955_s0 + $0x20] sm:$0xff]   ;;  %v819_v20 = vld [vmem:[%s955_s0 + $0x28] sm:$0xff]  }
   0x8   :  { %746 = vmatprep.subr.bf16.mxu0 %v808_v2  ;;  %v820_v21 = vld [vmem:[%s955_s0 + $0x30] sm:$0xff]   ;;  %v821_v22 = vld [vmem:[%s955_s0 + $0x38] sm:$0xff]   ;;  %v622_v48 = vld [vmem:[%s957_s3] ss:$0 sm:$0xff] }
   0x9   :  { %v829_v23 = vld [vmem:[%s956_s2 + $0x38] sm:$0xff]  }
   0xa   :  { %777 = vmatpush3.bf16.msra.mxu1 %v823_v8 }
   0xb   :  { %747 = vmatpush3.bf16.msra.mxu0 %v808_v2  ;;  %778 = vmatprep.subr.bf16.mxu1 %v824_v10 }
   0xc   :  { %748 = vmatprep.subr.bf16.mxu0 %v809_v3 }
   0xe   :  { %779 = vmatpush3.bf16.msra.mxu1 %v824_v10 }
   0xf   :  { %749 = vmatpush3.bf16.msra.mxu0 %v809_v3  ;;  %780 = vmatprep.subr.bf16.mxu1 %v825_v12 }
  0x10   :  { %750 = vmatprep.subr.bf16.mxu0 %v810_v5 }
  0x12   :  { %781 = vmatpush3.bf16.msra.mxu1 %v825_v12 }
  0x13   :  { %751 = vmatpush3.bf16.msra.mxu0 %v810_v5  ;;  %782 = vmatprep.subr.bf16.mxu1 %v826_v13 }
  0x14   :  { %752 = vmatprep.subr.bf16.mxu0 %v811_v6 }
  0x16   :  { %783 = vmatpush3.bf16.msra.mxu1 %v826_v13 }
  0x17   :  { %753 = vmatpush3.bf16.msra.mxu0 %v811_v6  ;;  %784 = vmatprep.subr.bf16.mxu1 %v827_v16 }
  0x18   :  { %754 = vmatprep.subr.bf16.mxu0 %v812_v9 }
  0x1a   :  { %785 = vmatpush3.bf16.msra.mxu1 %v827_v16 }
  0x1b   :  { %755 = vmatpush3.bf16.msra.mxu0 %v812_v9  ;;  %786 = vmatprep.subr.bf16.mxu1 %v828_v17 }
  0x1c   :  { %756 = vmatprep.subr.bf16.mxu0 %v813_v11 }
  0x1e   :  { %787 = vmatpush3.bf16.msra.mxu1 %v828_v17 }
  0x1f   :  { %757 = vmatpush3.bf16.msra.mxu0 %v813_v11  ;;  %788 = vmatprep.subr.bf16.mxu1 %v829_v23 }
  0x22   :  { %759 = vmatmul.mubr.bf16.vlgmr.msra.gmra.mrb[0].mxu0 %v815_v14  ;;  %789 = vmatpush3.bf16.msra.mxu1 %v829_v23 }
  0x23   :  { %762 = vmatprep.mubr.bf16.mxu0 %v816_v15 }
  0x2a   :  { %763 = vmatmul.mubr.bf16.gmra.mrb[4].mxu0 %v817_v18 }
  0x2b   :  { %766 = vmatprep.mubr.bf16.mxu0 %v818_v19 }
  0x32   :  { %767 = vmatmul.mubr.bf16.gmra.mrb[8].mxu0 %v819_v20 }
  0x33   :  { %770 = vmatprep.mubr.bf16.mxu0 %v820_v21 }
  0x3a   :  { %771 = vmatmul.mubr.bf16.gmra.mrb[12].mxu0 %v821_v22 }
  0xf5   :  { %v760_v24 = vpop.f32.mrb[0].mxu0 }
  0xf6   :  { %v216_v25 = vpop.f32.mrb[1].mxu0 }
  0xf7   :  { %v761_v26 = vpop.f32.mrb[2].mxu0 }
  0xf8   :  { %v331_v27 = vpack.c.bf16 %v761_v26, %v760_v24  ;;  %v219_v28 = vpop.f32.mrb[3].mxu0 }
  0xf9   :  { %v330_v29 = vpack.c.bf16 %v219_v28, %v216_v25 }
  0xfb   :  { %790 = vmatprep.mubr.bf16.mxu1 %v330_v29 }
  0xfc   :  { %791 = vmatmul.mubr.bf16.vlgmr.msra.gmra.mrb[0].mxu1 %v331_v27 }
  0xfd   :  { %v764_v30 = vpop.f32.mrb[4].mxu0 }
  0xfe   :  { %v232_v31 = vpop.f32.mrb[5].mxu0 }
  0xff   :  { %v765_v32 = vpop.f32.mrb[6].mxu0 }
 0x100   :  { %v333_v33 = vpack.c.bf16 %v765_v32, %v764_v30  ;;  %v235_v34 = vpop.f32.mrb[7].mxu0 }
 0x101   :  { %v332_v35 = vpack.c.bf16 %v235_v34, %v232_v31 }
 0x103   :  { %794 = vmatprep.mubr.bf16.mxu1 %v332_v35 }
 0x104   :  { %795 = vmatmul.mubr.bf16.gmra.mrb[4].mxu1 %v333_v33 }
 0x105   :  { %v768_v36 = vpop.f32.mrb[8].mxu0 }
 0x106   :  { %v248_v37 = vpop.f32.mrb[9].mxu0 }
 0x107   :  { %v769_v38 = vpop.f32.mrb[10].mxu0 }
 0x108   :  { %v335_v39 = vpack.c.bf16 %v769_v38, %v768_v36  ;;  %v251_v40 = vpop.f32.mrb[11].mxu0 }
 0x109   :  { %v334_v41 = vpack.c.bf16 %v251_v40, %v248_v37 }
 0x10b   :  { %798 = vmatprep.mubr.bf16.mxu1 %v334_v41 }
 0x10c   :  { %799 = vmatmul.mubr.bf16.gmra.mrb[8].mxu1 %v335_v39 }
 0x10d   :  { %v772_v42 = vpop.f32.mrb[12].mxu0 }
 0x10e   :  { %v264_v43 = vpop.f32.mrb[13].mxu0 }
 0x10f   :  { %v773_v44 = vpop.f32.mrb[14].mxu0 }
 0x110   :  { %v337_v45 = vpack.c.bf16 %v773_v44, %v772_v42  ;;  %v267_v46 = vpop.f32.mrb[15].mxu0 }
 0x111   :  { %v336_v47 = vpack.c.bf16 %v267_v46, %v264_v43 }
 0x113   :  { %802 = vmatprep.mubr.bf16.mxu1 %v336_v47 }
 0x114   :  { %803 = vmatmul.mubr.bf16.gmra.mrb[12].mxu1 %v337_v45 }
 0x1cf   :  { %v792_v49 = vpop.f32.mrb[0].mxu1 }
 0x1d0   :  { %v452_v50 = vadd.f32 %v792_v49, %v622_v48  ;;  %v443_v51 = vpop.f32.mrb[1].mxu1 }
 0x1d1   :  { %v444_v52 = vadd.f32 %v622_v48, %v443_v51  ;;  %v793_v53 = vpop.f32.mrb[2].mxu1 }
 0x1d2   :  { %v455_v54 = vadd.f32 %v793_v53, %v622_v48  ;;  %v446_v55 = vpop.f32.mrb[3].mxu1  ;;  %v508_v57 = vmax.f32 %v452_v50, 0.0 }
 0x1d3   :  { %v447_v56 = vadd.f32 %v622_v48, %v446_v55  ;;  %v506_v59 = vmax.f32 %v444_v52, 0.0 }
 0x1d4   :  { %v509_v58 = vmax.f32 %v455_v54, 0.0 }
 0x1d5   :  { %v507_v60 = vmax.f32 %v447_v56, 0.0 }
 0x1d6   :  { %v671_v61 = vpack.c.bf16 %v509_v58, %v508_v57 }
 0x1d7   :  { %v666_v62 = vpack.c.bf16 %v507_v60, %v506_v59  ;;  %v796_v63 = vpop.f32.mrb[4].mxu1 }
 0x1d8   :  { %703 = vst [vmem:[%s958_s4 + $0x8] sm:$0xff] %v671_v61   ;;  %v468_v0 = vadd.f32 %v796_v63, %v622_v48  ;;  %v459_v1 = vpop.f32.mrb[5].mxu1 }
 0x1d9   :  { %667 = vst [vmem:[%s958_s4] sm:$0xff] %v666_v62   ;;  %v460_v2 = vadd.f32 %v622_v48, %v459_v1  ;;  %v797_v3 = vpop.f32.mrb[6].mxu1 }
 0x1da   :  { %v471_v4 = vadd.f32 %v797_v3, %v622_v48  ;;  %v462_v5 = vpop.f32.mrb[7].mxu1  ;;  %v512_v7 = vmax.f32 %v468_v0, 0.0 }
 0x1db   :  { %v463_v6 = vadd.f32 %v622_v48, %v462_v5  ;;  %v510_v9 = vmax.f32 %v460_v2, 0.0 }
 0x1dc   :  { %v513_v8 = vmax.f32 %v471_v4, 0.0 }
 0x1dd   :  { %v511_v10 = vmax.f32 %v463_v6, 0.0 }
 0x1de   :  { %v681_v11 = vpack.c.bf16 %v513_v8, %v512_v7 }
 0x1df   :  { %v676_v12 = vpack.c.bf16 %v511_v10, %v510_v9  ;;  %v800_v13 = vpop.f32.mrb[8].mxu1 }
 0x1e0   :  { %705 = vst [vmem:[%s958_s4 + $0x18] sm:$0xff] %v681_v11   ;;  %v484_v14 = vadd.f32 %v800_v13, %v622_v48  ;;  %v475_v15 = vpop.f32.mrb[9].mxu1 }
 0x1e1   :  { %704 = vst [vmem:[%s958_s4 + $0x10] sm:$0xff] %v676_v12   ;;  %v476_v16 = vadd.f32 %v622_v48, %v475_v15  ;;  %v801_v17 = vpop.f32.mrb[10].mxu1 }
 0x1e2   :  { %v487_v18 = vadd.f32 %v801_v17, %v622_v48  ;;  %v478_v19 = vpop.f32.mrb[11].mxu1  ;;  %v516_v21 = vmax.f32 %v484_v14, 0.0 }
 0x1e3   :  { %v479_v20 = vadd.f32 %v622_v48, %v478_v19  ;;  %v514_v23 = vmax.f32 %v476_v16, 0.0 }
 0x1e4   :  { %v517_v22 = vmax.f32 %v487_v18, 0.0 }
 0x1e5   :  { %v515_v24 = vmax.f32 %v479_v20, 0.0 }
 0x1e6   :  { %v691_v25 = vpack.c.bf16 %v517_v22, %v516_v21 }
 0x1e7   :  { %v686_v26 = vpack.c.bf16 %v515_v24, %v514_v23  ;;  %v804_v27 = vpop.f32.mrb[12].mxu1 }
 0x1e8   :  { %707 = vst [vmem:[%s958_s4 + $0x28] sm:$0xff] %v691_v25   ;;  %v500_v28 = vadd.f32 %v804_v27, %v622_v48  ;;  %v491_v29 = vpop.f32.mrb[13].mxu1 }
 0x1e9   :  { %706 = vst [vmem:[%s958_s4 + $0x20] sm:$0xff] %v686_v26   ;;  %v492_v30 = vadd.f32 %v622_v48, %v491_v29  ;;  %v805_v31 = vpop.f32.mrb[14].mxu1 }
 0x1ea   :  { %v503_v32 = vadd.f32 %v805_v31, %v622_v48  ;;  %v494_v33 = vpop.f32.mrb[15].mxu1  ;;  %v520_v35 = vmax.f32 %v500_v28, 0.0 }
 0x1eb   :  { %v495_v34 = vadd.f32 %v622_v48, %v494_v33  ;;  %v518_v37 = vmax.f32 %v492_v30, 0.0 }
 0x1ec   :  { %v521_v36 = vmax.f32 %v503_v32, 0.0 }
 0x1ed   :  { %v519_v38 = vmax.f32 %v495_v34, 0.0 }
 0x1ee   :  { %v701_v39 = vpack.c.bf16 %v521_v36, %v520_v35 }
 0x1ef   :  { %v696_v40 = vpack.c.bf16 %v519_v38, %v518_v37 }
 0x1f0   :  { %709 = vst [vmem:[%s958_s4 + $0x38] sm:$0xff] %v701_v39  }
 0x1f1   :  { %708 = vst [vmem:[%s958_s4 + $0x30] sm:$0xff] %v696_v40  }

</bundles_post_ra>
